<compile_context>
chip_gen: v5e
topology: v5e:2x2
jax: 0.10.0
libtpu: 0.0.40
codegen_flags: <defaults>
</compile_context>

<pallas_src>
import numpy as np

import jax
import jax.numpy as jnp
from jax.experimental import pallas as pl
from jax.experimental.pallas import tpu as pltpu


def _round_up(v, m):
    return (v + m - 1) // m * m


def _floor_to(v, m):
    return max(m, v // m * m)


def _vmem_limit(estimate_bytes):
    # Derived from the actual per-step footprint; clamped to a v7x-safe
    # ceiling (64 MiB physical VMEM per TensorCore).
    return int(min(max(int(estimate_bytes * 1.25) + (2 << 20), 16 << 20),
                   48 << 20))


def _project_kernel(x_ref, w_ref, o_ref):
    """support[i] = x[i] @ W (bf16 MXU inputs, f32 accumulation)."""
    o_ref[...] = jnp.dot(x_ref[...], w_ref[...],
                         preferred_element_type=jnp.float32).astype(o_ref.dtype)


def _make_agg_kernel(tile_n, max_cnt, feat_resident, project_in_finalize):
    """Aggregation over nonzero source blocks of one dest-node tile.

    Grid = (dest block i, compacted nonzero source slot k).  acc (f32)
    accumulates A[i, src] @ feat[src]; at the last k the tile is (optionally
    projected to F_out and) written once, lane-dense, with the bias folded in.
    """

    def kernel(blk_ids_ref, blk_cnt_ref, a_ref, feat_ref, *rest):
        if project_in_finalize:
            w_ref, b_ref, out_ref, acc_ref = rest
        else:
            b_ref, out_ref, acc_ref = rest

        i = pl.program_id(0)
        k = pl.program_id(1)

        @pl.when(k == 0)
        def _init():
            acc_ref[...] = jnp.zeros_like(acc_ref)

        # Tail guard: dest block i only has blk_cnt[i] nonzero source blocks.
        @pl.when(k < blk_cnt_ref[i])
        def _accumulate():
            if feat_resident:
                src = blk_ids_ref[i * max_cnt + k]
                start = pl.multiple_of(src * tile_n, tile_n)
                feat = feat_ref[pl.ds(start, tile_n), :]
            else:
                feat = feat_ref[...]
            acc_ref[...] += jnp.dot(a_ref[...], feat,
                                    preferred_element_type=jnp.float32)

        @pl.when(k == pl.num_programs(1) - 1)
        def _finalize():
            if project_in_finalize:
                res = jnp.dot(acc_ref[...].astype(w_ref.dtype), w_ref[...],
                              preferred_element_type=jnp.float32) + b_ref[...]
            else:
                res = acc_ref[...] + b_ref[...]
            out_ref[...] = res.astype(out_ref.dtype)

    return kernel


def graph_convolution(x, edge_index, weight, bias=None, edge_weight=None, *,
                      tile_n=512, out_dtype=jnp.float32):
    """Pallas forward of GraphConvolution.

    x: (N, F_in), edge_index: (2, E) int, weight: (F_in, F_out),
    bias: (F_out,) or None, edge_weight: (E,) or None.

    NOTE: the nonzero-block structure of A is computed host-side from
    concrete edge indices, so this wrapper is not jit-traceable over
    edge_index (standard for sparse-preprocessed kernels).
    """
    n, f_in = x.shape
    f_out = weight.shape[1]
    e = edge_index.shape[1]

    if edge_weight is None:
        edge_weight = jnp.ones((e,), jnp.float32)
    if bias is None:
        bias = jnp.zeros((f_out,), jnp.float32)

    # ---- host-side preprocessing ------------------------------------------
    row = edge_index[0].astype(jnp.int32)
    col = edge_index[1].astype(jnp.int32)
    # Drop out-of-range edges (zero their weight) instead of redirecting them;
    # PyTorch scatter_add_ would raise on such input.
    valid = (row >= 0) & (row < n) & (col >= 0) & (col < n)
    ew = jnp.where(valid, edge_weight.astype(jnp.float32), 0.0)
    row = jnp.clip(row, 0, n - 1)
    col = jnp.clip(col, 0, n - 1)

    # Tile geometry, lane-dense everywhere:
    #  * feature dims padded to multiples of 128,
    #  * node dim padded to a multiple of the node tile,
    #  * node tile default 512 (better HBM streaming efficiency), clamped so
    #    the 'parallel' dest axis has >= 2 blocks (v7x: 2 TensorCores/chip).
    f_in_pad = _round_up(f_in, 128)
    f_out_pad = _round_up(f_out, 128)
    n_pad = _round_up(n, 128)
    tile_n = _floor_to(min(int(tile_n), n_pad), 128)
    if n_pad >= 256:
        tile_n = min(tile_n, _floor_to(n_pad // 2, 128))
    n_pad = _round_up(n_pad, tile_n)
    nb = n_pad // tile_n

    # Dense aggregation matrix A[c, r]; duplicate edges accumulate in f32
    # (matching scatter_add_), then cast to bf16 for the MXU.
    a = (jnp.zeros((n_pad, n_pad), jnp.float32)
         .at[col, row].add(ew)
         .astype(jnp.bfloat16))

    x_p = jnp.zeros((n_pad, f_in_pad), jnp.bfloat16).at[:n, :f_in].set(
        x.astype(jnp.bfloat16))
    w_p = jnp.zeros((f_in_pad, f_out_pad), jnp.bfloat16).at[:f_in, :f_out].set(
        weight.astype(jnp.bfloat16))
    b_p = jnp.zeros((1, f_out_pad), jnp.float32).at[0, :f_out].set(
        bias.astype(jnp.float32))

    # Nonzero-block structure of A (per dest block, which source blocks hold
    # at least one edge).  Scalar-prefetched so the k grid only visits
    # nonzero blocks; padded slots point at block 0 and are compute-skipped.
    row_np = np.asarray(jax.device_get(row))
    col_np = np.asarray(jax.device_get(col))
    if e > 0:
        pairs = np.unique(
            np.stack([col_np // tile_n, row_np // tile_n], axis=1), axis=0)
    else:
        pairs = np.zeros((0, 2), np.int64)
    blk_lists = [[] for _ in range(nb)]
    for d, s in pairs:
        blk_lists[int(d)].append(int(s))
    max_cnt = max(1, max(len(l) for l in blk_lists))
    blk_ids_np = np.zeros((nb, max_cnt), np.int32)
    blk_cnt_np = np.zeros((nb,), np.int32)
    for d, srcs in enumerate(blk_lists):
        blk_cnt_np[d] = len(srcs)
        blk_ids_np[d, :len(srcs)] = sorted(srcs)
    blk_ids = jnp.asarray(blk_ids_np.reshape(-1))   # flat 1-D -> cheap in SMEM
    blk_cnt = jnp.asarray(blk_cnt_np)

    # Aggregation order: run the O(N^2) sweep in the narrower feature space.
    project_first = f_out_pad <= f_in_pad
    feat_width = f_out_pad if project_first else f_in_pad
    out_isize = jnp.dtype(out_dtype).itemsize

    # ---- optional projection pass: support = x @ W -------------------------
    if project_first:
        proj_vmem = (2 * tile_n * f_in_pad * 2        # x tiles (double-buffered)
                     + 2 * f_in_pad * f_out_pad * 2   # W (full, constant)
                     + 2 * tile_n * f_out_pad * 2)    # support tiles
        feat = pl.pallas_call(
            _project_kernel,
            out_shape=jax.ShapeDtypeStruct((n_pad, f_out_pad), jnp.bfloat16),
            grid_spec=pltpu.PrefetchScalarGridSpec(
                num_scalar_prefetch=0,
                grid=(nb,),
                in_specs=[
                    pl.BlockSpec((tile_n, f_in_pad), lambda i: (i, 0)),
                    pl.BlockSpec((f_in_pad, f_out_pad), lambda i: (0, 0)),
                ],
                out_specs=pl.BlockSpec((tile_n, f_out_pad), lambda i: (i, 0)),
            ),
            compiler_params=pltpu.CompilerParams(
                dimension_semantics=("parallel",),
                vmem_limit_bytes=_vmem_limit(proj_vmem),
            ),
        )(x_p, w_p)
    else:
        feat = x_p

    # ---- residency decision for the feature matrix -------------------------
    resident_feat_bytes = 2 * n_pad * feat_width * 2      # conservative 2x
    streamed_feat_bytes = 2 * tile_n * feat_width * 2
    base_bytes = (2 * tile_n * tile_n * 2                  # A tiles
                  + 2 * tile_n * f_out_pad * out_isize     # out tiles
                  + tile_n * feat_width * 4                # acc scratch
                  + 2 * f_out_pad * 4)                     # bias
    if not project_first:
        base_bytes += 2 * f_in_pad * f_out_pad * 2         # W (full, constant)
    feat_resident = (base_bytes + resident_feat_bytes) <= (36 << 20)
    agg_vmem = base_bytes + (resident_feat_bytes if feat_resident
                             else streamed_feat_bytes)

    # ---- aggregation pass: out = A @ feat (+ @ W) + b -----------------------
    def a_index(i, k, blk_ids_ref, blk_cnt_ref):
        return (i, blk_ids_ref[i * max_cnt + k])

    if feat_resident:
        feat_spec = pl.BlockSpec((n_pad, feat_width), lambda i, k, *_: (0, 0))
    else:
        def feat_index(i, k, blk_ids_ref, blk_cnt_ref):
            return (blk_ids_ref[i * max_cnt + k], 0)
        feat_spec = pl.BlockSpec((tile_n, feat_width), feat_index)

    in_specs = [
        pl.BlockSpec((tile_n, tile_n), a_index),           # A
        feat_spec,                                         # x or support
    ]
    operands = [a, feat]
    if not project_first:
        in_specs.append(
            pl.BlockSpec((f_in_pad, f_out_pad), lambda i, k, *_: (0, 0)))
        operands.append(w_p)
    in_specs.append(pl.BlockSpec((1, f_out_pad), lambda i, k, *_: (0, 0)))
    operands.append(b_p)

    kernel = _make_agg_kernel(tile_n, max_cnt, feat_resident,
                              project_in_finalize=not project_first)

    out = pl.pallas_call(
        kernel,
        out_shape=jax.ShapeDtypeStruct((n_pad, f_out_pad), out_dtype),
        grid_spec=pltpu.PrefetchScalarGridSpec(
            num_scalar_prefetch=2,
            grid=(nb, max_cnt),
            in_specs=in_specs,
            out_specs=pl.BlockSpec((tile_n, f_out_pad), lambda i, k, *_: (i, 0)),
            scratch_shapes=[pltpu.VMEM((tile_n, feat_width), jnp.float32)],
        ),
        compiler_params=pltpu.CompilerParams(
            # dest-node blocks independent -> 'parallel' (megacore / v7x dual
            # TC); the compacted source-block axis is the innermost reduction.
            dimension_semantics=("parallel", "arbitrary"),
            vmem_limit_bytes=_vmem_limit(agg_vmem),
        ),
    )(blk_ids, blk_cnt, *operands)

    return out[:n, :f_out]


def _xavier_uniform(key, shape):
    fan_in, fan_out = shape
    bound = (6.0 / (fan_in + fan_out)) ** 0.5
    return jax.random.uniform(key, shape, jnp.float32, -bound, bound)


def _reference(x, edge_index, weight, bias, edge_weight):
    # Pure-JAX f32 reference mirroring the PyTorch scatter_add_ semantics.
    support = x @ weight
    row, col = edge_index[0], edge_index[1]
    msgs = support[row] * edge_weight[:, None]
    out = jnp.zeros_like(support).at[col].add(msgs)
    return out + bias[None, :]


def _check(name, out, ref, atol=1e-1, rtol=1e-1):
    assert out.shape == ref.shape, (name, out.shape, ref.shape)
    err = float(jnp.max(jnp.abs(out - ref)))
    # Tolerance reflects bf16 MXU inputs (f32 accumulation); structural bugs
    # produce O(1) differences.
    assert jnp.allclose(out, ref, atol=atol, rtol=rtol), (name, err)


if __name__ == "__main__":
    key = jax.random.PRNGKey(0)

    # ---- case 1: F_out <= F_in (padded) -> project-first path, 1 node block
    k_x, k_w, k_b, k_r, k_c, k_e, key = jax.random.split(key, 7)
    N, F_IN, F_OUT, E = 16, 8, 32, 64
    x = jax.random.normal(k_x, (N, F_IN), jnp.float32)
    weight = _xavier_uniform(k_w, (F_IN, F_OUT))
    bias = 0.1 * jax.random.normal(k_b, (F_OUT,), jnp.float32)
    row = jax.random.randint(k_r, (E,), 0, N, jnp.int32)
    col = jax.random.randint(k_c, (E,), 0, N, jnp.int32)
    edge_index = jnp.stack([row, col], axis=0)
    edge_weight = jax.random.uniform(k_e, (E,), jnp.float32)

    out = jax.block_until_ready(
        graph_convolution(x, edge_index, weight, bias, edge_weight))
    _check("case1", out, _reference(x, edge_index, weight, bias, edge_weight))

    # edge_weight=None default (ones).
    out_d = jax.block_until_ready(
        graph_convolution(x, edge_index, weight, bias, None))
    _check("case1_default", out_d,
           _reference(x, edge_index, weight, bias, jnp.ones((E,), jnp.float32)))

    # ---- case 2: F_in < F_out -> aggregate-first path, 3 node blocks with
    # uneven nonzero source-block counts (exercises the pl.when tail skip).
    k_x, k_w, k_b, k_r1, k_r2, k_c1, k_c2, k_e = jax.random.split(key, 8)
    N2, F_IN2, F_OUT2 = 300, 8, 200
    E1, E2 = 300, 200
    x2 = jax.random.normal(k_x, (N2, F_IN2), jnp.float32)
    weight2 = _xavier_uniform(k_w, (F_IN2, F_OUT2))
    bias2 = 0.1 * jax.random.normal(k_b, (F_OUT2,), jnp.float32)
    row2 = jnp.concatenate([
        jax.random.randint(k_r1, (E1,), 0, N2, jnp.int32),    # all src blocks
        jax.random.randint(k_r2, (E2,), 0, 128, jnp.int32),   # src block 0 only
    ])
    col2 = jnp.concatenate([
        jax.random.randint(k_c1, (E1,), 0, 128, jnp.int32),   # dest block 0
        jax.random.randint(k_c2, (E2,), 128, N2, jnp.int32),  # dest blocks 1,2
    ])
    edge_index2 = jnp.stack([row2, col2], axis=0)
    edge_weight2 = jax.random.uniform(k_e, (E1 + E2,), jnp.float32)

    out2 = jax.block_until_ready(
        graph_convolution(x2, edge_index2, weight2, bias2, edge_weight2))
    _check("case2", out2,
           _reference(x2, edge_index2, weight2, bias2, edge_weight2))

    print("KERNEL_OK")
</pallas_src>

<mosaic_0001>
module attributes {stable_mosaic.version = 11 : i64} {
  func.func @_project_kernel(%arg0: i32, %arg1: memref<128x128xbf16, #tpu.memory_space<vmem>>, %arg2: memref<128x128xbf16, #tpu.memory_space<vmem>>, %arg3: memref<128x128xbf16, #tpu.memory_space<vmem>>) attributes {dimension_semantics = [#tpu.dimension_semantics<parallel>], iteration_bounds = array<i64: 1>, scalar_prefetch = 0 : i64, scratch_operands = 0 : i64, tpu.core_type = #tpu.core_type<tc>, window_params = [{transform_indices = @transform_0, window_bounds = array<i64: 128, 128>}, {pipeline_mode = #tpu.pipeline_mode<synchronous>, transform_indices = @transform_1, window_bounds = array<i64: 128, 128>}, {transform_indices = @transform_2, window_bounds = array<i64: 128, 128>}]} {
    %c0 = arith.constant 0 : index
    %c0_0 = arith.constant 0 : index
    %0 = vector.load %arg1[%c0, %c0_0] : memref<128x128xbf16, #tpu.memory_space<vmem>>, vector<128x128xbf16>
    %c0_1 = arith.constant 0 : index
    %c0_2 = arith.constant 0 : index
    %1 = vector.load %arg2[%c0_1, %c0_2] : memref<128x128xbf16, #tpu.memory_space<vmem>>, vector<128x128xbf16>
    %cst = arith.constant dense<0.000000e+00> : vector<128x128xf32>
    %2 = tpu.matmul %0, %1, %cst {dimension_numbers = #tpu.dot_dimension_numbers<[1], [0], [0], [1], [0, 0, 1, 1], [], []>} : vector<128x128xbf16>, vector<128x128xbf16>, vector<128x128xf32> -> vector<128x128xf32>
    %3 = arith.truncf %2 : vector<128x128xf32> to vector<128x128xbf16>
    %c0_3 = arith.constant 0 : index
    %c0_4 = arith.constant 0 : index
    %4 = vector.load %arg3[%c0_3, %c0_4] : memref<128x128xbf16, #tpu.memory_space<vmem>>, vector<128x128xbf16>
    tpu.vector_store %arg3[%c0_3, %c0_4], %3 {strides = array<i32>} : memref<128x128xbf16, #tpu.memory_space<vmem>>, vector<128x128xbf16>,
    return
  }
  func.func @transform_0(%arg0: i32) -> (i32, i32) {
    %c0_i32 = arith.constant 0 : i32
    %c0_i32_0 = arith.constant 0 : i32
    return %arg0, %c0_i32 : i32, i32
  }
  func.func @transform_1(%arg0: i32) -> (i32, i32) {
    %c0_i32 = arith.constant 0 : i32
    %c0_i32_0 = arith.constant 0 : i32
    %c0_i32_1 = arith.constant 0 : i32
    return %c0_i32, %c0_i32_0 : i32, i32
  }
  func.func @transform_2(%arg0: i32) -> (i32, i32) {
    %c0_i32 = arith.constant 0 : i32
    %c0_i32_0 = arith.constant 0 : i32
    return %arg0, %c0_i32 : i32, i32
  }
}

</mosaic_0001>

<bundles_post_ra>
// kernel: tpu_custom_call.1
= control target key start
LH: loop header
LB: loop body
LE: loop exit
PB: predicated region body
PF: predicated region fallthrough
CT: control target
= control target key end

     0   :  { %7 = vsyncpa [#allocation3], 0  ;;  %s545_s0 = inlined_call_operand.hbm [shape: bf16[128,128], index: 0, kind: input, shape index: {}]   ;;  %s546_s1 = inlined_call_operand.hbm [shape: bf16[128,128], index: 1, kind: input, shape index: {}]   ;;  %s547_s2 = inlined_call_operand.hbm [shape: bf16[128,128], index: 2, kind: output, shape index: {}]  }
   0x1   :  { %8 = vsyncpa [#allocation6], 0 }
   0x2   :  { %9 = vsyncpa [#allocation4], 0  ;;  %s14_s11 = sshll.u32 %s545_s0, 4  ;;  %s507_s12 = smov [#allocation2]   ;;  %s15_s11 = int_to_ptr.hbm [resolvable:$true] %s14_s11 }
   0x3   :  { %s16_s13 = sshll.u32 %s507_s12, 4  ;;  %s27_s16 = sshll.u32 %s546_s1, 4  ;;  %s17_s13 = int_to_ptr.vmem [resolvable:$true] %s16_s13  ;;  %s28_s16 = int_to_ptr.hbm [resolvable:$true] %s27_s16 }
   0x4   :  { %s508_s17 = smov 64   ;;  %s509_s18 = smov 4  }
   0x5   :  { %22 = dma.hbm_to_vmem [thread:$0]  %s15_s11, 1024, %s17_s13, [#allocation3], %s508_s17, %s508_s17, %s509_s18  }
   0x6   :  { %s510_s19 = smov [#allocation5]  }
   0x7   :  { %s29_s20 = sshll.u32 %s510_s19, 4  ;;  %s30_s20 = int_to_ptr.vmem [resolvable:$true] %s29_s20 }
   0x8   :  { %35 = dma.hbm_to_vmem [thread:$0]  %s28_s16, 1024, %s30_s20, [#allocation6], %s508_s17, %s508_s17, %s509_s18  }
   0x9   :  { %501 = dma.done.wait [#allocation3], 1024  }
   0xa   :  { %502 = vsyncadd [#allocation3], 4294966272 }
   0xb   :  { %503 = dma.done.wait [#allocation6], 1024  }
   0xc   :  { %504 = vsyncadd [#allocation6], 4294966272  ;;  %v352_v0 = vld [vmem:[#allocation5 + $0x38] sm:$0xff]  ;;  %v351_v1 = vld [vmem:[#allocation5 + $0x30] sm:$0xff]  ;;  %s511_s0 = smov [#allocation7]   ;;  %s259_s23 = sshll.u32 %s547_s2, 4  ;;  %s260_s23 = int_to_ptr.hbm [resolvable:$true] %s259_s23 }
   0xd   :  { %172 = vmatpush.bf16.msra.mxu0 %v352_v0  ;;  %400 = vmatpush.bf16.msra.mxu1 %v352_v0  ;;  %v350_v2 = vld [vmem:[#allocation5 + $0x28] sm:$0xff]  ;;  %v349_v3 = vld [vmem:[#allocation5 + $0x20] sm:$0xff]  ;;  %v348_v4 = vld [vmem:[#allocation5 + $0x18] sm:$0xff]  ;;  %s257_s1 = sshll.u32 %s511_s0, 4  ;;  %s258_s1 = int_to_ptr.vmem [resolvable:$true] %s257_s1 }
   0xe   :  { %401 = vmatpush.bf16.msra.mxu2 %v352_v0  ;;  %402 = vmatpush.bf16.msra.mxu3 %v352_v0  ;;  %v347_v5 = vld [vmem:[#allocation5 + $0x10] sm:$0xff]  ;;  %v346_v6 = vld [vmem:[#allocation5 + $0x8] sm:$0xff]  ;;  %v345_v7 = vld [vmem:[#allocation5] sm:$0xff] }
   0xf   :  { %v337_v8 = vld [vmem:[#allocation2] sm:$0xff]  ;;  %v339_v9 = vld [vmem:[#allocation2 + $0x10] sm:$0xff]  ;;  %v338_v12 = vld [vmem:[#allocation2 + $0x8] sm:$0xff] }
  0x10   :  { %v341_v10 = vld [vmem:[#allocation2 + $0x20] sm:$0xff]  ;;  %v343_v11 = vld [vmem:[#allocation2 + $0x30] sm:$0xff]  ;;  %v340_v13 = vld [vmem:[#allocation2 + $0x18] sm:$0xff] }
  0x11   :  { %173 = vmatpush.bf16.msra.mxu0 %v351_v1  ;;  %403 = vmatpush.bf16.msra.mxu1 %v351_v1  ;;  %v342_v14 = vld [vmem:[#allocation2 + $0x28] sm:$0xff]  ;;  %v344_v15 = vld [vmem:[#allocation2 + $0x38] sm:$0xff] }
  0x12   :  { %404 = vmatpush.bf16.msra.mxu2 %v351_v1  ;;  %405 = vmatpush.bf16.msra.mxu3 %v351_v1 }
  0x15   :  { %174 = vmatpush.bf16.msra.mxu0 %v350_v2  ;;  %406 = vmatpush.bf16.msra.mxu1 %v350_v2 }
  0x16   :  { %407 = vmatpush.bf16.msra.mxu2 %v350_v2  ;;  %408 = vmatpush.bf16.msra.mxu3 %v350_v2 }
  0x19   :  { %175 = vmatpush.bf16.msra.mxu0 %v349_v3  ;;  %409 = vmatpush.bf16.msra.mxu1 %v349_v3 }
  0x1a   :  { %410 = vmatpush.bf16.msra.mxu2 %v349_v3  ;;  %411 = vmatpush.bf16.msra.mxu3 %v349_v3 }
  0x1d   :  { %176 = vmatpush.bf16.msra.mxu0 %v348_v4  ;;  %412 = vmatpush.bf16.msra.mxu1 %v348_v4 }
  0x1e   :  { %413 = vmatpush.bf16.msra.mxu2 %v348_v4  ;;  %414 = vmatpush.bf16.msra.mxu3 %v348_v4 }
  0x21   :  { %177 = vmatpush.bf16.msra.mxu0 %v347_v5  ;;  %415 = vmatpush.bf16.msra.mxu1 %v347_v5 }
  0x22   :  { %416 = vmatpush.bf16.msra.mxu2 %v347_v5  ;;  %417 = vmatpush.bf16.msra.mxu3 %v347_v5 }
  0x25   :  { %178 = vmatpush.bf16.msra.mxu0 %v346_v6  ;;  %418 = vmatpush.bf16.msra.mxu1 %v346_v6 }
  0x26   :  { %419 = vmatpush.bf16.msra.mxu2 %v346_v6  ;;  %420 = vmatpush.bf16.msra.mxu3 %v346_v6 }
  0x29   :  { %179 = vmatpush.bf16.msra.mxu0 %v345_v7  ;;  %421 = vmatpush.bf16.msra.mxu1 %v345_v7 }
  0x2a   :  { %422 = vmatpush.bf16.msra.mxu2 %v345_v7  ;;  %423 = vmatpush.bf16.msra.mxu3 %v345_v7 }
  0x2c   :  { %180 = vmatmul.bf16.vlgmr.msra.gmra.mxu0 %v337_v8  ;;  %190 = vmatmul.bf16.vlgmr.msra.gmra.mxu1 %v339_v9 }
  0x2d   :  { %200 = vmatmul.bf16.vlgmr.msra.gmra.mxu2 %v341_v10  ;;  %210 = vmatmul.bf16.vlgmr.msra.gmra.mxu3 %v343_v11 }
  0x3c   :  { %185 = vmatmul.bf16.gmra.mxu0 %v338_v12  ;;  %195 = vmatmul.bf16.gmra.mxu1 %v340_v13 }
  0x3d   :  { %205 = vmatmul.bf16.gmra.mxu2 %v342_v14  ;;  %215 = vmatmul.bf16.gmra.mxu3 %v344_v15 }
  0xa9   :  { %v181_v16 = vpop.f32.mrf.mxu0  ;;  %v191_v17 = vpop.f32.mrf.mxu1 }
  0xb0   :  { %v201_v18 = vpop.f32.mrf.mxu2  ;;  %v211_v19 = vpop.f32.mrf.mxu3 }
  0xb1   :  { %v183_v20 = vpop.f32.mrf.mxu0  ;;  %v193_v21 = vpop.f32.mrf.mxu1 }
  0xb2   :  { %v356_v22 = vpack.c.bf16 %v183_v20, %v181_v16  ;;  %v366_v23 = vpack.c.bf16 %v193_v21, %v191_v17 }
  0xb4   :  { %357 = vst [vmem:[#allocation7] sm:$0xff] %v356_v22  }
  0xb5   :  { %394 = vst [vmem:[#allocation7 + $0x10] sm:$0xff] %v366_v23  }
  0xb8   :  { %v203_v24 = vpop.f32.mrf.mxu2  ;;  %v213_v25 = vpop.f32.mrf.mxu3 }
  0xb9   :  { %v376_v26 = vpack.c.bf16 %v203_v24, %v201_v18  ;;  %v386_v27 = vpack.c.bf16 %v213_v25, %v211_v19  ;;  %v186_v28 = vpop.f32.mrf.mxu0  ;;  %v196_v29 = vpop.f32.mrf.mxu1 }
  0xbb   :  { %396 = vst [vmem:[#allocation7 + $0x20] sm:$0xff] %v376_v26  }
  0xbc   :  { %398 = vst [vmem:[#allocation7 + $0x30] sm:$0xff] %v386_v27  }
  0xc0   :  { %v206_v30 = vpop.f32.mrf.mxu2  ;;  %v216_v31 = vpop.f32.mrf.mxu3 }
  0xc1   :  { %v188_v32 = vpop.f32.mrf.mxu0  ;;  %v198_v33 = vpop.f32.mrf.mxu1 }
  0xc2   :  { %v361_v34 = vpack.c.bf16 %v188_v32, %v186_v28  ;;  %v371_v35 = vpack.c.bf16 %v198_v33, %v196_v29 }
  0xc4   :  { %393 = vst [vmem:[#allocation7 + $0x8] sm:$0xff] %v361_v34  }
  0xc5   :  { %395 = vst [vmem:[#allocation7 + $0x18] sm:$0xff] %v371_v35  }
  0xc8   :  { %v208_v36 = vpop.f32.mrf.mxu2  ;;  %v218_v37 = vpop.f32.mrf.mxu3 }
  0xc9   :  { %v381_v38 = vpack.c.bf16 %v208_v36, %v206_v30  ;;  %v391_v39 = vpack.c.bf16 %v218_v37, %v216_v31 }
  0xcb   :  { %397 = vst [vmem:[#allocation7 + $0x28] sm:$0xff] %v381_v38  }
  0xcc   :  { %399 = vst [vmem:[#allocation7 + $0x38] sm:$0xff] %v391_v39  }
  0xcd   :  { %265 = dma.vmem_to_hbm [thread:$0]  %s258_s1, 1024, %s260_s23, [#allocation4], %s508_s17, %s508_s17, %s509_s18  }
  0xce   :  { %505 = dma.done.wait [#allocation4], 1024  }
  0xcf   :  { %506 = vsyncadd [#allocation4], 4294966272 }
  0xd0   :  { %270 = vsyncpa [#allocation3], 1 }
  0xd1   :  { %271 = vsyncpa [#allocation6], 1 }
  0xd2   :  { %272 = vsyncpa [#allocation4], 1 }

</bundles_post_ra>
